<compile_context>
chip_gen: v7x
topology: tpu7x:2x2x1
jax: 0.10.0
libtpu: 0.0.40
codegen_flags: <defaults>
</compile_context>

<pallas_src>
import jax
import jax.numpy as jnp
from jax.experimental import pallas as pl
from jax.experimental.pallas import tpu as pltpu

_LANES = 128
_NEG = float(-1e30)  # big finite negative: exp() underflows to 0, never wins top-k


def _router_kernel(top_k: int):
    def kernel(x_ref, w_ref, b_ref, rw_ref, idx_ref, probs_ref):
        x = x_ref[...]                                   # (TB, H)     bf16
        w = w_ref[...]                                   # (H, E_pad)  bf16
        b = b_ref[...]                                   # (1, E_pad)  f32

        # ---- router linear layer: bf16 operands on the MXU, f32 accumulate ----
        logits = jnp.dot(x, w, preferred_element_type=jnp.float32) + b
        TB, E_pad = logits.shape

        # ---- softmax over all experts (padded logits ~ -1e30 -> exp == 0) ----
        m_all = jnp.max(logits, axis=-1, keepdims=True)
        e_all = jnp.exp(logits - m_all)
        s_all = jnp.sum(e_all, axis=-1, keepdims=True)
        # EUP vrcp (free slot) + one Newton refinement -> ~f32-accurate 1/x.
        inv_all = pl.reciprocal(s_all, approx=True)
        inv_all = inv_all * (2.0 - s_all * inv_all)
        probs_ref[...] = e_all * inv_all

        # ---- top-k via iterative argmax (K small & static) ----
        # Reuse m_all as the first iteration's row max; build the selected set
        # by OR-ing boolean one-hots (no f32 mask accumulation).
        col_ids = jax.lax.broadcasted_iota(jnp.int32, (TB, E_pad), 1)
        work = logits
        cur_max = m_all
        selected = None
        idx_cols = []
        for j in range(top_k):
            if j > 0:
                cur_max = jnp.max(work, axis=-1, keepdims=True)
            is_max = work == cur_max
            # first occurrence among ties (matches torch.topk ordering)
            idx = jnp.min(jnp.where(is_max, col_ids, E_pad),
                          axis=-1, keepdims=True)         # (TB, 1) i32
            onehot = col_ids == idx
            selected = onehot if selected is None else (selected | onehot)
            work = jnp.where(onehot, _NEG, work)
            idx_cols.append(idx)

        # Scatter the K indices into a (TB, K) i32 slab.  K equals the full
        # array's last dim, so no 128-lane padding and no dead writeback.
        lane_ids = jax.lax.broadcasted_iota(jnp.int32, (TB, top_k), 1)
        idx_out = jnp.zeros((TB, top_k), jnp.int32)
        for j, idx in enumerate(idx_cols):
            idx_out = jnp.where(lane_ids == j, idx, idx_out)
        idx_ref[...] = idx_out

        # ---- softmax over the selected logits ----
        # The top-k set always contains the global row max, so m_sel == m_all
        # and we can reuse e_all directly (no second max / exp pass).
        e_sel = jnp.where(selected, e_all, 0.0)
        s_sel = jnp.sum(e_sel, axis=-1, keepdims=True)
        inv_sel = pl.reciprocal(s_sel, approx=True)
        inv_sel = inv_sel * (2.0 - s_sel * inv_sel)
        rw_ref[...] = e_sel * inv_sel

    return kernel


def _vmem_capacity_bytes():
    """Per-core VMEM capacity (128 MiB on v5e/v6e, 64 MiB per-TC on v7x).
    Falls back to the most conservative value if the query is unavailable."""
    try:
        return int(pltpu.get_tpu_info().vmem_capacity_bytes)
    except Exception:
        return 64 << 20


def _choose_tb(H, E_pad, K, budget_bytes):
    """Largest batch tile whose working set fits the generation-aware budget.
    Counts BOTH allocated buffers of the constant-index weight/bias blocks
    (Pallas double-buffers them even though they are only fetched once)."""
    for tb in (4096, 2048, 1024, 512, 256, 128, 64, 32, 16, 8):
        tile = (2 * tb * H * 2                              # double-buffered bf16 x
                + 2 * (H * E_pad * 2 + E_pad * 4)           # weight (bf16) + bias (f32), 2 bufs
                + 2 * tb * (2 * E_pad * 4 + K * 4))         # double-buffered f32 rw/probs + i32 idx
        if tile <= budget_bytes:
            return tb
    return 8


def dynamic_moe_router(x, w, b, top_k, *, tb=None):
    """x: (B, H) f32, w: (H, E) f32, b: (E,) f32 ->
       (routing_weights (B,E) f32, top_k_indices (B,K) i32, all_probs (B,E) f32)."""
    B, H = x.shape
    E = w.shape[1]
    K = min(top_k, E)
    E_pad = max(_LANES, -(-E // _LANES) * _LANES)

    # Generation-aware VMEM budget: ~96 MiB on 128 MiB parts (v5e/v6e),
    # ~48 MiB on v7x's 64 MiB per-TC (the "parallel" grid axis splits across
    # both TensorCores, so the budget must be per-TC).
    cap = _vmem_capacity_bytes()
    vmem_limit = (cap * 3) // 4
    budget = max(vmem_limit - (6 << 20), 8 << 20)   # headroom for Mosaic scratch

    if tb is None:
        tb = _choose_tb(H, E_pad, K, budget)
    TB = min(tb, B)
    n_tiles = -(-B // TB)
    B_pad = n_tiles * TB

    # bf16 operands for the MXU (cast in the wrapper so the HBM copies are
    # bf16); zero weight columns + huge-negative f32 bias => padded experts
    # get ~zero probability and never appear in the top-k.
    x_bf = x.astype(jnp.bfloat16)
    w_p = jnp.pad(w.astype(jnp.bfloat16), ((0, 0), (0, E_pad - E)))
    b_p = jnp.pad(b.reshape(1, E).astype(jnp.float32), ((0, 0), (0, E_pad - E)),
                  constant_values=_NEG)
    x_p = jnp.pad(x_bf, ((0, B_pad - B), (0, 0))) if B_pad != B else x_bf

    rw, idx, probs = pl.pallas_call(
        _router_kernel(K),
        out_shape=(
            jax.ShapeDtypeStruct((B_pad, E_pad), jnp.float32),  # routing_weights
            jax.ShapeDtypeStruct((B_pad, K), jnp.int32),        # top_k_indices
            jax.ShapeDtypeStruct((B_pad, E_pad), jnp.float32),  # all_probs
        ),
        grid=(n_tiles,),
        in_specs=[
            pl.BlockSpec((TB, H), lambda i: (i, 0)),      # stream bf16 x tiles
            pl.BlockSpec((H, E_pad), lambda i: (0, 0)),   # weight resident (fetched once)
            pl.BlockSpec((1, E_pad), lambda i: (0, 0)),   # bias resident (fetched once)
        ],
        out_specs=(
            pl.BlockSpec((TB, E_pad), lambda i: (i, 0)),
            pl.BlockSpec((TB, K), lambda i: (i, 0)),      # unpadded K-wide index slab
            pl.BlockSpec((TB, E_pad), lambda i: (i, 0)),
        ),
        compiler_params=pltpu.CompilerParams(
            dimension_semantics=("parallel",),   # megacore sharding on v7x
            vmem_limit_bytes=int(vmem_limit),
        ),
    )(x_p, w_p, b_p)

    return rw[:B, :E], idx[:B, :K], probs[:B, :E]


if __name__ == "__main__":
    def reference(x, w, b, K):
        # Match the kernel's bf16 operand rounding (accumulation stays f32).
        xq = x.astype(jnp.bfloat16).astype(jnp.float32)
        wq = w.astype(jnp.bfloat16).astype(jnp.float32)
        logits = xq @ wq + b
        all_probs = jax.nn.softmax(logits, axis=-1)
        topk_vals, topk_idx = jax.lax.top_k(logits, K)
        topk_probs = jax.nn.softmax(topk_vals, axis=-1)
        Bq = x.shape[0]
        rw = jnp.zeros_like(logits).at[jnp.arange(Bq)[:, None], topk_idx].set(topk_probs)
        return rw, topk_idx.astype(jnp.int32), all_probs

    # Small, deterministic setup consistent with the module's forward.
    B, H, E, K = 8, 32, 8, 2
    key = jax.random.PRNGKey(0)
    kx, kw, kb = jax.random.split(key, 3)
    bound = 1.0 / (H ** 0.5)
    x = jax.random.normal(kx, (B, H), dtype=jnp.float32)
    # nn.Linear(H, E) default init: U(-1/sqrt(H), 1/sqrt(H)); stored transposed (H, E).
    w = jax.random.uniform(kw, (H, E), jnp.float32, -bound, bound)
    b = jax.random.uniform(kb, (E,), jnp.float32, -bound, bound)

    # case 1: single batch tile
    rw, idx, probs = jax.block_until_ready(dynamic_moe_router(x, w, b, K))
    rw_r, idx_r, probs_r = reference(x, w, b, K)
    assert jnp.allclose(probs, probs_r, atol=2e-5)
    assert jnp.array_equal(idx, idx_r)
    assert jnp.allclose(rw, rw_r, atol=2e-5)

    # case 2: multiple batch tiles + batch padding (B=20, TB=8 -> 3 grid steps)
    B2 = 20
    x2 = jax.random.normal(jax.random.PRNGKey(1), (B2, H), dtype=jnp.float32)
    rw2, idx2, probs2 = jax.block_until_ready(dynamic_moe_router(x2, w, b, K, tb=8))
    rw2_r, idx2_r, probs2_r = reference(x2, w, b, K)
    assert jnp.allclose(probs2, probs2_r, atol=2e-5)
    assert jnp.array_equal(idx2, idx2_r)
    assert jnp.allclose(rw2, rw2_r, atol=2e-5)

    print("KERNEL_OK")
</pallas_src>

<mosaic_0001>
module attributes {stable_mosaic.version = 11 : i64} {
  func.func @kernel(%arg0: i32, %arg1: memref<8x32xbf16, #tpu.memory_space<vmem>>, %arg2: memref<32x128xbf16, #tpu.memory_space<vmem>>, %arg3: memref<1x128xf32, #tpu.memory_space<vmem>>, %arg4: memref<8x128xf32, #tpu.memory_space<vmem>>, %arg5: memref<8x2xi32, #tpu.memory_space<vmem>>, %arg6: memref<8x128xf32, #tpu.memory_space<vmem>>) attributes {dimension_semantics = [#tpu.dimension_semantics<parallel>], iteration_bounds = array<i64: 1>, scalar_prefetch = 0 : i64, scratch_operands = 0 : i64, tpu.core_type = #tpu.core_type<tc>, window_params = [{transform_indices = @transform_0, window_bounds = array<i64: 8, 32>}, {pipeline_mode = #tpu.pipeline_mode<synchronous>, transform_indices = @transform_1, window_bounds = array<i64: 32, 128>}, {pipeline_mode = #tpu.pipeline_mode<synchronous>, transform_indices = @transform_2, window_bounds = array<i64: 1, 128>}, {transform_indices = @transform_3, window_bounds = array<i64: 8, 128>}, {transform_indices = @transform_4, window_bounds = array<i64: 8, 2>}, {transform_indices = @transform_5, window_bounds = array<i64: 8, 128>}]} {
    %c0 = arith.constant 0 : index
    %c0_0 = arith.constant 0 : index
    %0 = vector.load %arg1[%c0, %c0_0] : memref<8x32xbf16, #tpu.memory_space<vmem>>, vector<8x32xbf16>
    %c0_1 = arith.constant 0 : index
    %c0_2 = arith.constant 0 : index
    %1 = vector.load %arg2[%c0_1, %c0_2] : memref<32x128xbf16, #tpu.memory_space<vmem>>, vector<32x128xbf16>
    %c0_3 = arith.constant 0 : index
    %c0_4 = arith.constant 0 : index
    %2 = vector.load %arg3[%c0_3, %c0_4] : memref<1x128xf32, #tpu.memory_space<vmem>>, vector<1x128xf32>
    %cst = arith.constant dense<0.000000e+00> : vector<8x128xf32>
    %3 = tpu.matmul %0, %1, %cst {dimension_numbers = #tpu.dot_dimension_numbers<[1], [0], [0], [1], [0, 0, 1, 1], [], []>} : vector<8x32xbf16>, vector<32x128xbf16>, vector<8x128xf32> -> vector<8x128xf32>
    %4 = vector.broadcast %2 : vector<1x128xf32> to vector<8x128xf32>
    %5 = arith.addf %3, %4 : vector<8x128xf32>
    %cst_5 = arith.constant dense<0xFF800000> : vector<8xf32>
    %6 = vector.multi_reduction <maximumf>, %5, %cst_5 [1] : vector<8x128xf32> to vector<8xf32>
    %7 = vector.shape_cast %6 : vector<8xf32> to vector<8x1xf32>
    %8 = vector.broadcast %7 : vector<8x1xf32> to vector<8x128xf32>
    %9 = arith.subf %5, %8 : vector<8x128xf32>
    %10 = math.exp %9 : vector<8x128xf32>
    %cst_6 = arith.constant dense<0.000000e+00> : vector<8xf32>
    %11 = vector.multi_reduction <add>, %10, %cst_6 [1] : vector<8x128xf32> to vector<8xf32>
    %12 = vector.shape_cast %11 : vector<8xf32> to vector<8x1xf32>
    %13 = tpu.reciprocal %12 {approx = true} : vector<8x1xf32> -> vector<8x1xf32>
    %14 = arith.mulf %12, %13 : vector<8x1xf32>
    %cst_7 = arith.constant 2.000000e+00 : f32
    %15 = vector.broadcast %cst_7 : f32 to vector<8x1xf32>
    %16 = arith.subf %15, %14 : vector<8x1xf32>
    %17 = arith.mulf %13, %16 : vector<8x1xf32>
    %18 = vector.broadcast %17 : vector<8x1xf32> to vector<8x128xf32>
    %19 = arith.mulf %10, %18 : vector<8x128xf32>
    %c0_8 = arith.constant 0 : index
    %c0_9 = arith.constant 0 : index
    %20 = vector.load %arg6[%c0_8, %c0_9] : memref<8x128xf32, #tpu.memory_space<vmem>>, vector<8x128xf32>
    tpu.vector_store %arg6[%c0_8, %c0_9], %19 {strides = array<i32>} : memref<8x128xf32, #tpu.memory_space<vmem>>, vector<8x128xf32>,
    %21 = tpu.iota {dimensions = array<i32: 1>} : vector<8x128xi32>
    %22 = vector.broadcast %7 : vector<8x1xf32> to vector<8x128xf32>
    %23 = arith.cmpf oeq, %5, %22 : vector<8x128xf32>
    %c128_i32 = arith.constant 128 : i32
    %24 = vector.broadcast %c128_i32 : i32 to vector<8x128xi32>
    %25 = arith.select %23, %21, %24 : vector<8x128xi1>, vector<8x128xi32>
    %cst_10 = arith.constant dense<2147483647> : vector<8xi32>
    %26 = vector.multi_reduction <minsi>, %25, %cst_10 [1] : vector<8x128xi32> to vector<8xi32>
    %27 = vector.shape_cast %26 : vector<8xi32> to vector<8x1xi32>
    %28 = vector.broadcast %27 : vector<8x1xi32> to vector<8x128xi32>
    %29 = arith.cmpi eq, %21, %28 : vector<8x128xi32>
    %cst_11 = arith.constant -1.000000e+30 : f32
    %30 = vector.broadcast %cst_11 : f32 to vector<8x128xf32>
    %31 = arith.select %29, %30, %5 : vector<8x128xi1>, vector<8x128xf32>
    %cst_12 = arith.constant dense<0xFF800000> : vector<8xf32>
    %32 = vector.multi_reduction <maximumf>, %31, %cst_12 [1] : vector<8x128xf32> to vector<8xf32>
    %33 = vector.shape_cast %32 : vector<8xf32> to vector<8x1xf32>
    %34 = vector.broadcast %33 : vector<8x1xf32> to vector<8x128xf32>
    %35 = arith.cmpf oeq, %31, %34 : vector<8x128xf32>
    %c128_i32_13 = arith.constant 128 : i32
    %36 = vector.broadcast %c128_i32_13 : i32 to vector<8x128xi32>
    %37 = arith.select %35, %21, %36 : vector<8x128xi1>, vector<8x128xi32>
    %cst_14 = arith.constant dense<2147483647> : vector<8xi32>
    %38 = vector.multi_reduction <minsi>, %37, %cst_14 [1] : vector<8x128xi32> to vector<8xi32>
    %39 = vector.shape_cast %38 : vector<8xi32> to vector<8x1xi32>
    %40 = vector.broadcast %39 : vector<8x1xi32> to vector<8x128xi32>
    %41 = arith.cmpi eq, %21, %40 : vector<8x128xi32>
    %42 = arith.ori %29, %41 : vector<8x128xi1>
    %43 = tpu.iota {dimensions = array<i32: 1>} : vector<8x2xi32>
    %c0_i32 = arith.constant 0 : i32
    %44 = vector.broadcast %c0_i32 : i32 to vector<8x2xi32>
    %c0_i32_15 = arith.constant 0 : i32
    %45 = vector.broadcast %c0_i32_15 : i32 to vector<8x2xi32>
    %46 = arith.cmpi eq, %43, %45 : vector<8x2xi32>
    %47 = vector.shape_cast %27 : vector<8x1xi32> to vector<8x1xi32>
    %48 = vector.broadcast %47 : vector<8x1xi32> to vector<8x2xi32>
    %49 = arith.select %46, %48, %44 : vector<8x2xi1>, vector<8x2xi32>
    %c1_i32 = arith.constant 1 : i32
    %50 = vector.broadcast %c1_i32 : i32 to vector<8x2xi32>
    %51 = arith.cmpi eq, %43, %50 : vector<8x2xi32>
    %52 = vector.shape_cast %39 : vector<8x1xi32> to vector<8x1xi32>
    %53 = vector.broadcast %52 : vector<8x1xi32> to vector<8x2xi32>
    %54 = arith.select %51, %53, %49 : vector<8x2xi1>, vector<8x2xi32>
    %c0_16 = arith.constant 0 : index
    %c0_17 = arith.constant 0 : index
    %55 = vector.load %arg5[%c0_16, %c0_17] : memref<8x2xi32, #tpu.memory_space<vmem>>, vector<8x2xi32>
    tpu.vector_store %arg5[%c0_16, %c0_17], %54 {strides = array<i32>} : memref<8x2xi32, #tpu.memory_space<vmem>>, vector<8x2xi32>,
    %cst_18 = arith.constant 0.000000e+00 : f32
    %56 = vector.broadcast %cst_18 : f32 to vector<8x128xf32>
    %57 = arith.select %42, %10, %56 : vector<8x128xi1>, vector<8x128xf32>
    %cst_19 = arith.constant dense<0.000000e+00> : vector<8xf32>
    %58 = vector.multi_reduction <add>, %57, %cst_19 [1] : vector<8x128xf32> to vector<8xf32>
    %59 = vector.shape_cast %58 : vector<8xf32> to vector<8x1xf32>
    %60 = tpu.reciprocal %59 {approx = true} : vector<8x1xf32> -> vector<8x1xf32>
    %61 = arith.mulf %59, %60 : vector<8x1xf32>
    %cst_20 = arith.constant 2.000000e+00 : f32
    %62 = vector.broadcast %cst_20 : f32 to vector<8x1xf32>
    %63 = arith.subf %62, %61 : vector<8x1xf32>
    %64 = arith.mulf %60, %63 : vector<8x1xf32>
    %65 = vector.broadcast %64 : vector<8x1xf32> to vector<8x128xf32>
    %66 = arith.mulf %57, %65 : vector<8x128xf32>
    %c0_21 = arith.constant 0 : index
    %c0_22 = arith.constant 0 : index
    %67 = vector.load %arg4[%c0_21, %c0_22] : memref<8x128xf32, #tpu.memory_space<vmem>>, vector<8x128xf32>
    tpu.vector_store %arg4[%c0_21, %c0_22], %66 {strides = array<i32>} : memref<8x128xf32, #tpu.memory_space<vmem>>, vector<8x128xf32>,
    return
  }
  func.func @transform_0(%arg0: i32) -> (i32, i32) {
    %c0_i32 = arith.constant 0 : i32
    %c0_i32_0 = arith.constant 0 : i32
    return %arg0, %c0_i32 : i32, i32
  }
  func.func @transform_1(%arg0: i32) -> (i32, i32) {
    %c0_i32 = arith.constant 0 : i32
    %c0_i32_0 = arith.constant 0 : i32
    %c0_i32_1 = arith.constant 0 : i32
    return %c0_i32, %c0_i32_0 : i32, i32
  }
  func.func @transform_2(%arg0: i32) -> (i32, i32) {
    %c0_i32 = arith.constant 0 : i32
    %c0_i32_0 = arith.constant 0 : i32
    %c0_i32_1 = arith.constant 0 : i32
    return %c0_i32, %c0_i32_0 : i32, i32
  }
  func.func @transform_3(%arg0: i32) -> (i32, i32) {
    %c0_i32 = arith.constant 0 : i32
    %c0_i32_0 = arith.constant 0 : i32
    return %arg0, %c0_i32 : i32, i32
  }
  func.func @transform_4(%arg0: i32) -> (i32, i32) {
    %c0_i32 = arith.constant 0 : i32
    %c0_i32_0 = arith.constant 0 : i32
    return %arg0, %c0_i32 : i32, i32
  }
  func.func @transform_5(%arg0: i32) -> (i32, i32) {
    %c0_i32 = arith.constant 0 : i32
    %c0_i32_0 = arith.constant 0 : i32
    return %arg0, %c0_i32 : i32, i32
  }
}

</mosaic_0001>

<bundles_post_ra>
// kernel: tpu_custom_call.1
= control target key start
LH: loop header
LB: loop body
LE: loop exit
PB: predicated region body
PF: predicated region fallthrough
CT: control target
= control target key end

     0   :  { %11 = vsyncpa [#allocation3], 0  ;;  %s444_s0 = inlined_call_operand.hbm [shape: bf16[8,32], index: 0, kind: input, shape index: {}]   ;;  %s445_s1 = inlined_call_operand.hbm [shape: bf16[32,128], index: 1, kind: input, shape index: {}]   ;;  %s446_s2 = inlined_call_operand.vmem [shape: f32[1,128], index: 2, kind: input, shape index: {}]   ;;  %s447_s3 = inlined_call_operand.hbm [shape: f32[8,128], index: 3, kind: output, shape index: {0}]   ;;  %s448_s4 = inlined_call_operand.vmem [shape: s32[8,2], index: 4, kind: output, shape index: {1}]   ;;  %s449_s5 = inlined_call_operand.hbm [shape: f32[8,128], index: 5, kind: output, shape index: {2}]  }
   0x1   :  { %12 = vsyncpa [#allocation6], 0 }
   0x2   :  { %13 = vsyncpa [#allocation4], 0 }
   0x3   :  { %14 = vsyncpa [#allocation9], 0  ;;  %s343_s18 = smov [#allocation2]   ;;  %s344_s20 = smov [#allocation5]  }
   0x4   :  { %s21_s19 = sshll.u32 %s343_s18, 4  ;;  %s30_s21 = sshll.u32 %s344_s20, 4  ;;  %s22_s19 = int_to_ptr.vmem [resolvable:$true] %s21_s19  ;;  %s381_s21 = int_to_ptr.vmem [resolvable:$true] %s30_s21 }
   0x5   :  { %s247_s24 = scalar_lea.hbm %s444_s0, 64 }
   0x6   :  { %p248_p0 = scmp.ne.s32.totalorder %s444_s0, %s247_s24  ;;  %p251_p1 = scmp.lt.u32.totalorder %s247_s24, %s444_s0 }
   0x8   :  { %p253_p2 = pnand %p251_p1, %p248_p0 }
   0xa   :  { %256 = shalt.err (!%p253_p2)
}
   0xb   :  { %s257_s29 = scalar_lea.vmem %s22_s19, 64  ;;  %p262_p4 = scmp.lt.s32.totalorder %s22_s19, %s22_s19 }
   0xc   :  { %p258_p3 = scmp.ne.s32.totalorder %s22_s19, %s257_s29  ;;  %p263_p5 = scmp.lt.s32.totalorder %s257_s29, %s257_s29 }
   0xe   :  { %p264_p6 = por %p263_p5, %p262_p4 }
  0x10   :  { %p265_p7 = pnand %p264_p6, %p258_p3 }
  0x12   :  { %268 = shalt.err (!%p265_p7)
}
  0x13   :  { %24 = dma.hbm_to_vmem [thread:$0]  %s444_s0, 64, %s22_s19, [#allocation3]  }
  0x14   :  { %s269_s9 = scalar_lea.hbm %s445_s1, 256 }
  0x15   :  { %p270_p8 = scmp.ne.s32.totalorder %s445_s1, %s269_s9  ;;  %p273_p9 = scmp.lt.u32.totalorder %s269_s9, %s445_s1 }
  0x17   :  { %p275_p10 = pnand %p273_p9, %p270_p8 }
  0x19   :  { %278 = shalt.err (!%p275_p10)
}
  0x1a   :  { %s279_s14 = scalar_lea.vmem %s381_s21, 256  ;;  %p284_p12 = scmp.lt.s32.totalorder %s381_s21, %s381_s21 }
  0x1b   :  { %p280_p11 = scmp.ne.s32.totalorder %s381_s21, %s279_s14  ;;  %p285_p13 = scmp.lt.s32.totalorder %s279_s14, %s279_s14 }
  0x1d   :  { %p286_p0 = por %p285_p13, %p284_p12 }
  0x1f   :  { %p287_p1 = pnand %p286_p0, %p280_p11 }
  0x21   :  { %290 = shalt.err (!%p287_p1)
}
  0x22   :  { %s345_s0 = smov 64   ;;  %s346_s15 = smov 4  }
  0x23   :  { %36 = dma.hbm_to_vmem [thread:$0]  %s445_s1, 256, %s381_s21, [#allocation6], %s345_s0, %s345_s0, %s346_s15  }
  0x24   :  { %335 = dma.done.wait [#allocation3], 64  }
  0x25   :  { %336 = vsyncadd [#allocation3], 4294967232 }
  0x26   :  { %337 = dma.done.wait [#allocation6], 256  }
  0x27   :  { %338 = vsyncadd [#allocation6], 4294967040  ;;  %v347_v0 = vmov 0.0   ;;  %vm348_vm0 = vmmov 0   ;;  %v239_v1 = vld [vmem:[#allocation5] sm:$0xff]   ;;  %v240_v2 = vld [vmem:[#allocation5 + $0x8] sm:$0xff]   ;;  %v127_v10 = vlaneseq }
  0x28   :  { %223 = vmatprep.subr.bf16.mxu0 %v347_v0  ;;  %227 = vmatprep.mubr.msk.bf16.mxu0 %vm348_vm0, %v347_v0  ;;  %v46_v3 = vld [vmem:[#allocation2] sm:$0xf]  ;;  %vm70_vm1 = vcmask 261120   ;;  %v216_v4 = vld [vmem:[%s446_s2] ss:$0 sm:$0xff]  ;;  %vm171_vm9 = vcmask 15360  }
  0x29   :  { %224 = vmatpush3.bf16.msra.mxu0 %v239_v1  ;;  %v128_v11 = vand.u32 127, %v127_v10  ;;  %s349_s20 = smov [#allocation8]  }
  0x2a   :  { %225 = vmatprep.subr.bf16.mxu0 %v347_v0  ;;  %s200_s21 = sshll.u32 %s349_s20, 4  ;;  %s201_s21 = int_to_ptr.vmem [resolvable:$true] %s200_s21 }
  0x2b   :  { %vm167_vm7 = vcmp.eq.s32.totalorder %v128_v11, 0  ;;  %vm169_vm8 = vcmp.eq.s32.totalorder %v128_v11, 1  ;;  %s291_s22 = scalar_lea.vmem %s201_s21, 128  ;;  %p296_p3 = scmp.lt.s32.totalorder %s201_s21, %s201_s21 }
  0x2c   :  { %p292_p2 = scmp.ne.s32.totalorder %s201_s21, %s291_s22  ;;  %p297_p4 = scmp.lt.s32.totalorder %s291_s22, %s291_s22 }
  0x2d   :  { %226 = vmatpush3.bf16.msra.mxu0 %v240_v2 }
  0x2e   :  { %p298_p5 = por %p297_p4, %p296_p3 }
  0x30   :  { %228 = vmatmul.mubr.msk.bf16.vlgmr.msra.gmra.mrb[0].mxu0 %vm70_vm1, %v46_v3  ;;  %p299_p6 = pnand %p298_p5, %p292_p2 }
 0x103   :  { %v108_v5 = vpop.f32.mrb[0].mxu0 }
 0x104   :  { %v109_v6 = vadd.f32 %v216_v4, %v108_v5  ;;  %v229_v7 = vpop.f32.mrb[1].mxu0 }
 0x105   :  { %v111_v8 = vpop.f32.mrb[2].mxu0 }
 0x106   :  { %114 = vmax.xlane.f32.xlu0 %v109_v6  ;;  %v230_v9 = vpop.f32.mrb[3].mxu0 }
 0x193   :  { %v115_v12 = vpop.xlane.xlu0 %114 }
 0x194   :  { %vm129_vm2 = vcmp.eq.f32.partialorder %v109_v6, %v115_v12  ;;  %v116_v26 = vsub.f32 %v109_v6, %v115_v12 }
 0x195   :  { %v130_v13 = vsel %vm129_vm2, %v128_v11, 128 }
 0x196   :  { %v132_v14 = vshra.s32 %v130_v13, 16  ;;  %v131_v16 = vand.u32 65535, %v130_v13  ;;  %v117_v27 = vmul.f32 1.442695, %v116_v26 }
 0x198   :  { %v134_v15 = vcvt.s32.f32 %v132_v14  ;;  %v133_v18 = vcvt.s32.f32 %v131_v16  ;;  %241 = vpow2.f32 %v117_v27 }
 0x19a   :  { %135 = vmin.xlane.f32.xlu0 %v134_v15 }
 0x1a2   :  { %v242_v32 = vpop.eup %241 }
 0x227   :  { %v136_v17 = vpop.xlane.xlu0 %135 }
 0x228   :  { %vm137_vm3 = vcmp.eq.f32.partialorder %v134_v15, %v136_v17  ;;  %v142_v20 = vcvt.f32.s32 %v136_v17 }
 0x229   :  { %v138_v19 = vsel %vm137_vm3, %v133_v18, inf }
 0x22a   :  { %139 = vmin.xlane.f32.xlu1 %v138_v19  ;;  %v143_v22 = vshll.u32 %v142_v20, 16 }
 0x2b7   :  { %v140_v21 = vpop.xlane.xlu1 %139 }
 0x2b8   :  { %v141_v23 = vcvt.f32.s32 %v140_v21 }
 0x2ba   :  { %v144_v24 = vadd.s32 %v143_v22, %v141_v23 }
 0x2bc   :  { %vm145_vm4 = vcmp.eq.s32.totalorder %v128_v11, %v144_v24  ;;  %v168_v48 = vsel %vm167_vm7, %v144_v24, 0 }
 0x2bd   :  { %v146_v25 = vsel %vm145_vm4, -1e+30, %v109_v6 }
 0x2be   :  { %147 = vmax.xlane.f32.xlu1 %v146_v25 }
 0x34b   :  { %v148_v28 = vpop.xlane.xlu1 %147 }
 0x34c   :  { %vm149_vm5 = vcmp.eq.f32.partialorder %v146_v25, %v148_v28 }
 0x34d   :  { %v150_v29 = vsel %vm149_vm5, %v128_v11, 128 }
 0x34e   :  { %v152_v30 = vshra.s32 %v150_v29, 16  ;;  %v151_v33 = vand.u32 65535, %v150_v29 }
 0x350   :  { %v154_v31 = vcvt.s32.f32 %v152_v30  ;;  %v153_v35 = vcvt.s32.f32 %v151_v33 }
 0x352   :  { %155 = vmin.xlane.f32.xlu0 %v154_v31 }
 0x356   :  { %119 = vadd.xlane.f32.xlu0 %v242_v32 }
 0x3df   :  { %v156_v34 = vpop.xlane.xlu0 %155 }
 0x3e0   :  { %vm157_vm6 = vcmp.eq.f32.partialorder %v154_v31, %v156_v34  ;;  %v162_v43 = vcvt.f32.s32 %v156_v34 }
 0x3e1   :  { %v158_v36 = vsel %vm157_vm6, %v153_v35, inf }
 0x3e2   :  { %159 = vmin.xlane.f32.xlu1 %v158_v36  ;;  %v163_v45 = vshll.u32 %v162_v43, 16 }
 0x3e3   :  { %v120_v37 = vpop.xlane.xlu0 %119 }
 0x3e4   :  { %243 = vrcp.f32 %v120_v37 }
 0x3ee   :  { %v244_v38 = vpop.eup %243 }
 0x3ef   :  { %v122_v39 = vmul.f32 %v244_v38, %v120_v37 }
 0x3f1   :  { %v123_v40 = vsub.f32 2.0, %v122_v39 }
 0x3f3   :  { %v124_v41 = vmul.f32 %v244_v38, %v123_v40 }
 0x3f5   :  { %v125_v42 = vmul.f32 %v242_v32, %v124_v41 }
 0x3f7   :  { %126 = vst [vmem:[#allocation8] sm:$0xff] %v125_v42 }
 0x46f   :  { %v160_v44 = vpop.xlane.xlu1 %159 }
 0x470   :  { %v161_v46 = vcvt.f32.s32 %v160_v44 }
 0x472   :  { %v164_v47 = vadd.s32 %v163_v45, %v161_v46 }
 0x474   :  { %v170_v49 = vsel %vm169_vm8, %v164_v47, %v168_v48  ;;  %vm165_vm10 = vcmp.eq.s32.totalorder %v128_v11, %v164_v47 }
 0x475   :  { %172 = vst.msk [vmem:[%s448_s4] sm:$0xff] %vm171_vm9, %v170_v49  ;;  %vm166_vm11 = vmor %vm145_vm4, %vm165_vm10 }
 0x476   :  { %v173_v50 = vsel %vm166_vm11, %v242_v32, 0.0 }
 0x477   :  { %174 = vadd.xlane.f32.xlu1 %v173_v50 }
 0x478   :  { %302 = shalt.err (!%p299_p6)
}
 0x479   :  { %s303_s25 = scalar_lea.hbm %s449_s5, 128 }
 0x47a   :  { %p304_p7 = scmp.ne.s32.totalorder %s449_s5, %s303_s25  ;;  %p307_p8 = scmp.lt.u32.totalorder %s303_s25, %s449_s5 }
 0x47c   :  { %p309_p9 = pnand %p307_p8, %p304_p7 }
 0x47e   :  { %312 = shalt.err (!%p309_p9)
}
 0x47f   :  { %203 = dma.vmem_to_hbm [thread:$0]  %s201_s21, 128, %s449_s5, [#allocation9]  }
 0x480   :  { %s350_s6 = smov [#allocation7]  }
 0x481   :  { %s188_s7 = sshll.u32 %s350_s6, 4  ;;  %s189_s7 = int_to_ptr.vmem [resolvable:$true] %s188_s7 }
 0x482   :  { %s313_s8 = scalar_lea.vmem %s189_s7, 128  ;;  %p318_p11 = scmp.lt.s32.totalorder %s189_s7, %s189_s7 }
 0x483   :  { %p314_p10 = scmp.ne.s32.totalorder %s189_s7, %s313_s8  ;;  %p319_p12 = scmp.lt.s32.totalorder %s313_s8, %s313_s8 }
 0x485   :  { %p320_p13 = por %p319_p12, %p318_p11 }
 0x487   :  { %p321_p0 = pnand %p320_p13, %p314_p10 }
 0x504   :  { %v175_v51 = vpop.xlane.xlu1 %174 }
 0x505   :  { %245 = vrcp.f32 %v175_v51 }
 0x50f   :  { %v246_v52 = vpop.eup %245 }
 0x510   :  { %v177_v53 = vmul.f32 %v246_v52, %v175_v51 }
 0x512   :  { %v178_v54 = vsub.f32 2.0, %v177_v53 }
 0x514   :  { %v179_v55 = vmul.f32 %v246_v52, %v178_v54 }
 0x516   :  { %v180_v56 = vmul.f32 %v179_v55, %v173_v50 }
 0x518   :  { %181 = vst [vmem:[#allocation7] sm:$0xff] %v180_v56 }
 0x519   :  { %324 = shalt.err (!%p321_p0)
}
 0x51a   :  { %s325_s10 = scalar_lea.hbm %s447_s3, 128 }
 0x51b   :  { %p326_p1 = scmp.ne.s32.totalorder %s447_s3, %s325_s10  ;;  %p329_p2 = scmp.lt.u32.totalorder %s325_s10, %s447_s3 }
 0x51d   :  { %p331_p3 = pnand %p329_p2, %p326_p1 }
 0x51f   :  { %334 = shalt.err (!%p331_p3)
}
 0x520   :  { %191 = dma.vmem_to_hbm [thread:$0]  %s189_s7, 128, %s447_s3, [#allocation4]  }
 0x521   :  { %339 = dma.done.wait [#allocation4], 128  }
 0x522   :  { %340 = vsyncadd [#allocation4], 4294967168 }
 0x523   :  { %341 = dma.done.wait [#allocation9], 128  }
 0x524   :  { %342 = vsyncadd [#allocation9], 4294967168 }
 0x525   :  { %212 = vsyncpa [#allocation3], 1 }
 0x526   :  { %213 = vsyncpa [#allocation6], 1 }
 0x527   :  { %214 = vsyncpa [#allocation4], 1 }
 0x528   :  { %215 = vsyncpa [#allocation9], 1 }

</bundles_post_ra>
